<compile_context>
chip_gen: v7x
topology: tpu7x:2x2x1
jax: 0.10.0
libtpu: 0.0.40
codegen_flags: <defaults>
</compile_context>

<pallas_src>
import functools

import jax
import jax.numpy as jnp
from jax.experimental import pallas as pl
from jax.experimental.pallas import tpu as pltpu


def _round_up(n, m):
    return (n + m - 1) // m * m


def _device_defaults():
    """(base batch-tile rows, number of TensorCores) for the current TPU generation."""
    kind = ""
    try:
        kind = jax.devices()[0].device_kind.lower()
    except Exception:
        pass
    is_v5e = ("v5e" in kind) or ("v5 lite" in kind) or ("v5lite" in kind)
    is_v7 = "v7" in kind
    base_rows = 128 if is_v5e else 256   # v5e: 4x128^2 MXU + 16 MiB default scoped VMEM
    num_tc = 2 if is_v7 else 1
    return base_rows, num_tc


def _resident_spec(shape):
    """Constant-index (broadcast) block; single-buffered since it never changes."""
    idx = lambda b: (0,) * len(shape)
    try:
        return pl.BlockSpec(shape, idx, pipeline_mode=pl.Buffered(1))
    except TypeError:  # older jax without pipeline_mode kwarg
        return pl.BlockSpec(shape, idx)


def _gru_cell_kernel(x_ref, h_ref, wx_ref, wh_ref, bmain_ref, bcand_h_ref, o_ref, *, hp):
    """Fused complex GRU cell on one (TB, ...) row tile.

    x_ref      : (TB, 2*Ip)   bf16  [x.re | x.im] (each half zero-padded)
    h_ref      : (TB, 2*hp)   f32   [h.re | h.im]
    wx_ref     : (2*Ip, 6*hp) bf16  x-side block weights, gate order [reset|update|cand]
    wh_ref     : (2*hp, 6*hp) bf16  h-side block weights
    bmain_ref  : (1, 6*hp)    f32   [b_r(W1+R1) | b_z(W2+R2) | b_n(W3)]
    bcand_h_ref: (1, 2*hp)    f32   candidate h-side bias (R3)
    o_ref      : (TB, 2*hp)   f32   [h_new.re | h_new.im]
    """
    h2 = 2 * hp
    h4 = 4 * hp
    x = x_ref[...]                       # bf16 already (MXU-only operand)
    h = h_ref[...]                       # f32 (also used in the elementwise update)

    # Two MXU matmuls cover all six ComplexLinear layers (bf16 in, f32 accumulate).
    gx = jnp.dot(x, wx_ref[...], preferred_element_type=jnp.float32)
    gh = jnp.dot(h.astype(jnp.bfloat16), wh_ref[...], preferred_element_type=jnp.float32)

    # reset / update gates.  complex_sigmoid is elementwise on real & imag halves.
    # sigmoid(v) = 0.5 * (1 + tanh(0.5 * v))  -> single EUP op per element.
    rz = gx[:, :h4] + gh[:, :h4] + bmain_ref[:, :h4]
    rz = 0.5 + 0.5 * jnp.tanh(0.5 * rz)
    r_r, r_i = rz[:, :hp], rz[:, hp:h2]
    z_r, z_i = rz[:, h2:3 * hp], rz[:, 3 * hp:h4]

    # candidate: n = complex_tanh( W3(x) + r * R3(h) )   (r * . is a complex multiply)
    gxn = gx[:, h4:] + bmain_ref[:, h4:]
    ghn = gh[:, h4:] + bcand_h_ref[...]
    ghn_r, ghn_i = ghn[:, :hp], ghn[:, hp:]
    n_r = jnp.tanh(gxn[:, :hp] + r_r * ghn_r - r_i * ghn_i)
    n_i = jnp.tanh(gxn[:, hp:] + r_r * ghn_i + r_i * ghn_r)

    # h_new = (1 - z) * n + z * h  (complex) ; write the two halves directly.
    h_r, h_i = h[:, :hp], h[:, hp:]
    o_ref[:, :hp] = (1.0 - z_r) * n_r + z_i * n_i + z_r * h_r - z_i * h_i
    o_ref[:, hp:] = (1.0 - z_r) * n_i - z_i * n_r + z_r * h_i + z_i * h_r


def _block_weight(w_r, w_i, in_pad, out_pad):
    """PyTorch Linear weights (out,in) -> real block matrix mapping
    [in.re | in.im] (padded to in_pad each) -> [out.re | out.im] (padded to out_pad)."""
    out_f, in_f = w_r.shape
    wr_t = jnp.asarray(w_r, jnp.float32).T
    wi_t = jnp.asarray(w_i, jnp.float32).T
    blk = jnp.zeros((2 * in_pad, 2 * out_pad), jnp.float32)
    blk = blk.at[:in_f, :out_f].set(wr_t)
    blk = blk.at[:in_f, out_pad:out_pad + out_f].set(wi_t)
    blk = blk.at[in_pad:in_pad + in_f, :out_f].set(-wi_t)
    blk = blk.at[in_pad:in_pad + in_f, out_pad:out_pad + out_f].set(wr_t)
    return blk


def _block_bias(b_r, b_i, out_pad):
    out_f = b_r.shape[0]
    br = jnp.asarray(b_r, jnp.float32)
    bi = jnp.asarray(b_i, jnp.float32)
    b = jnp.zeros((2 * out_pad,), jnp.float32)
    b = b.at[:out_f].set(br - bi)
    b = b.at[out_pad:out_pad + out_f].set(br + bi)
    return b


def pack_complex_gru_cell(params, input_length, hidden_length, weight_dtype=jnp.bfloat16):
    """Precompute the fused block weights/biases ONCE (hoisted out of the per-call path).

    params: dict of 6 ComplexLinear layers, each a tuple (w_r, w_i, b_r, b_i) with
    PyTorch Linear layout (out_features, in_features) / (out_features,):
      'reset_w','reset_r','update_w','update_r','cand_w','cand_r'
    Note: bf16 weights are fine for a single step; for long recurrent rollouts that must
    track the f32 PyTorch reference bit-closely, pass weight_dtype=jnp.float32.
    """
    I, H = input_length, hidden_length
    Ip = _round_up(I, 64)     # 2*Ip is a multiple of 128 lanes
    Hp = _round_up(H, 128)    # every real/imag half starts on a 128-lane boundary

    # gate order along N: [reset | update | candidate]
    wx = jnp.concatenate([_block_weight(*params["reset_w"][:2], Ip, Hp),
                          _block_weight(*params["update_w"][:2], Ip, Hp),
                          _block_weight(*params["cand_w"][:2], Ip, Hp)],
                         axis=1).astype(weight_dtype)
    wh = jnp.concatenate([_block_weight(*params["reset_r"][:2], Hp, Hp),
                          _block_weight(*params["update_r"][:2], Hp, Hp),
                          _block_weight(*params["cand_r"][:2], Hp, Hp)],
                         axis=1).astype(weight_dtype)

    # r/z gates consume bias(W)+bias(R) combined; candidate keeps x-side bias in b_main
    # and h-side bias separate (it is multiplied by r before the tanh).
    b_r = _block_bias(*params["reset_w"][2:], Hp) + _block_bias(*params["reset_r"][2:], Hp)
    b_z = _block_bias(*params["update_w"][2:], Hp) + _block_bias(*params["update_r"][2:], Hp)
    b_nx = _block_bias(*params["cand_w"][2:], Hp)
    b_main = jnp.concatenate([b_r, b_z, b_nx]).reshape(1, 6 * Hp)
    b_cand_h = _block_bias(*params["cand_r"][2:], Hp).reshape(1, 2 * Hp)

    return {"wx": wx, "wh": wh, "b_main": b_main, "b_cand_h": b_cand_h,
            "I": I, "H": H, "Ip": Ip, "Hp": Hp}


def complex_gru_cell_packed(x, h, packed, *, block_rows=None, interpret=False):
    """One ComplexGRUCell step.  x: (B, I) complex64, h: (B, H) complex64 -> (B, H) complex64."""
    B, I = x.shape
    _, H = h.shape
    assert I == packed["I"] and H == packed["H"]
    Ip, Hp = packed["Ip"], packed["Hp"]

    if block_rows is None:
        base_rows, num_tc = _device_defaults()
        block_rows = min(base_rows, _round_up(B, 16))
        if num_tc > 1 and B > 16:
            # ensure >= num_tc grid steps so every TensorCore gets work (v7x megacore)
            block_rows = min(block_rows, _round_up(pl.cdiv(B, num_tc), 16))
    TB = max(16, _round_up(block_rows, 16))
    Bp = _round_up(B, TB)

    # stacked-[real | imag] inputs, zero padded; x only feeds the MXU -> bf16.
    xc = jnp.zeros((Bp, 2 * Ip), jnp.float32)
    xc = xc.at[:B, :I].set(jnp.real(x).astype(jnp.float32))
    xc = xc.at[:B, Ip:Ip + I].set(jnp.imag(x).astype(jnp.float32))
    xc = xc.astype(jnp.bfloat16)
    hc = jnp.zeros((Bp, 2 * Hp), jnp.float32)
    hc = hc.at[:B, :H].set(jnp.real(h).astype(jnp.float32))
    hc = hc.at[:B, Hp:Hp + H].set(jnp.imag(h).astype(jnp.float32))

    wx, wh = packed["wx"], packed["wh"]
    b_main, b_cand_h = packed["b_main"], packed["b_cand_h"]

    # Explicit VMEM budget: x/h/out blocks double-buffered, weights/biases single-buffered,
    # plus the f32 gx/gh intermediates.  Clamped to v7x's 64 MiB/TC ceiling.
    vmem_bytes = (2 * TB * 2 * Ip * 2              # x blocks (bf16)
                  + 2 * TB * 2 * Hp * 4            # h blocks (f32)
                  + 2 * TB * 2 * Hp * 4            # out blocks (f32)
                  + wx.size * wx.dtype.itemsize
                  + wh.size * wh.dtype.itemsize
                  + (b_main.size + b_cand_h.size) * 4
                  + 3 * TB * 6 * Hp * 4)           # gx/gh + elementwise temporaries
    vmem_limit = min(max(int(vmem_bytes * 1.5) + (2 << 20), 16 << 20), 64 << 20)

    flops = 2 * Bp * (2 * Ip + 2 * Hp) * 6 * Hp
    bytes_accessed = (xc.size * 2 + 4 * (hc.size + Bp * 2 * Hp)
                      + wx.size * wx.dtype.itemsize + wh.size * wh.dtype.itemsize
                      + 4 * (b_main.size + b_cand_h.size))
    cost = pl.CostEstimate(flops=flops, transcendentals=Bp * 6 * Hp,
                           bytes_accessed=bytes_accessed)

    out = pl.pallas_call(
        functools.partial(_gru_cell_kernel, hp=Hp),
        out_shape=jax.ShapeDtypeStruct((Bp, 2 * Hp), jnp.float32),
        grid=(Bp // TB,),
        in_specs=[
            pl.BlockSpec((TB, 2 * Ip), lambda b: (b, 0)),
            pl.BlockSpec((TB, 2 * Hp), lambda b: (b, 0)),
            _resident_spec((2 * Ip, 6 * Hp)),
            _resident_spec((2 * Hp, 6 * Hp)),
            _resident_spec((1, 6 * Hp)),
            _resident_spec((1, 2 * Hp)),
        ],
        out_specs=pl.BlockSpec((TB, 2 * Hp), lambda b: (b, 0)),
        compiler_params=pltpu.CompilerParams(
            dimension_semantics=("parallel",),
            vmem_limit_bytes=vmem_limit),
        cost_estimate=cost,
        interpret=interpret,
    )(xc, hc, wx, wh, b_main, b_cand_h)

    h_new = out[:B, :H] + 1j * out[:B, Hp:Hp + H]
    return h_new.astype(jnp.complex64)


def complex_gru_cell(x, h, params, *, block_rows=None, interpret=False):
    """Convenience one-shot wrapper (packs weights per call).  For repeated invocation,
    call pack_complex_gru_cell once and reuse complex_gru_cell_packed."""
    packed = pack_complex_gru_cell(params, x.shape[1], h.shape[1])
    return complex_gru_cell_packed(x, h, packed, block_rows=block_rows, interpret=interpret)


# ---------------- pure-JAX reference (checks the Pallas kernel) ----------------
def _ref_complex_linear(inp, w_r, w_i, b_r, b_i):
    fr = lambda t: t @ w_r.T + b_r
    fi = lambda t: t @ w_i.T + b_i
    xr = jnp.real(inp).astype(jnp.float32)
    xi = jnp.imag(inp).astype(jnp.float32)
    return (fr(xr) - fi(xi)) + 1j * (fr(xi) + fi(xr))


def _c_sigmoid(v):
    return jax.nn.sigmoid(jnp.real(v)) + 1j * jax.nn.sigmoid(jnp.imag(v))


def _c_tanh(v):
    return jnp.tanh(jnp.real(v)) + 1j * jnp.tanh(jnp.imag(v))


def _ref_complex_gru_cell(x, h, params):
    lin = lambda t, p: _ref_complex_linear(t, *p)
    r = _c_sigmoid(lin(x, params["reset_w"]) + lin(h, params["reset_r"]))
    z = _c_sigmoid(lin(h, params["update_r"]) + lin(x, params["update_w"]))
    n = _c_tanh(lin(x, params["cand_w"]) + r * lin(h, params["cand_r"]))
    return ((1.0 - z) * n + z * h).astype(jnp.complex64)


if __name__ == "__main__":
    # ComplexGRUCell(input_length=16, hidden_length=32), batch = 8
    B, I, H = 8, 16, 32

    key = jax.random.PRNGKey(0)
    keys = jax.random.split(key, 25)
    kit = iter(keys)

    def make_linear(in_f, out_f):
        lim = float(in_f) ** -0.5
        w_r = jax.random.uniform(next(kit), (out_f, in_f), jnp.float32, -lim, lim)
        w_i = jax.random.uniform(next(kit), (out_f, in_f), jnp.float32, -lim, lim)
        b_r = jax.random.uniform(next(kit), (out_f,), jnp.float32, -lim, lim)
        b_i = jax.random.uniform(next(kit), (out_f,), jnp.float32, -lim, lim)
        return (w_r, w_i, b_r, b_i)

    params = {
        "reset_w": make_linear(I, H),
        "reset_r": make_linear(H, H),
        "update_w": make_linear(I, H),
        "update_r": make_linear(H, H),
        "cand_w": make_linear(I, H),
        "cand_r": make_linear(H, H),
    }

    kx1, kx2, kh1, kh2 = jax.random.split(next(kit), 4)
    x = (jax.random.normal(kx1, (B, I), jnp.float32)
         + 1j * jax.random.normal(kx2, (B, I), jnp.float32)).astype(jnp.complex64)
    h = (jax.random.normal(kh1, (B, H), jnp.float32)
         + 1j * jax.random.normal(kh2, (B, H), jnp.float32)).astype(jnp.complex64)

    # Pack once (hoisted out of the per-step path), then run the fused kernel.
    packed = jax.tree_util.tree_map(jax.block_until_ready,
                                    pack_complex_gru_cell(params, I, H))
    h_new = jax.block_until_ready(complex_gru_cell_packed(x, h, packed))
    ref = jax.block_until_ready(_ref_complex_gru_cell(x, h, params))

    assert h_new.shape == (B, H) and h_new.dtype == jnp.complex64
    # bf16-in / f32-accumulate MXU matmuls vs. f32 reference: ~1e-2-level gate rounding.
    err = float(jnp.max(jnp.abs(h_new - ref)))
    assert err < 5e-2, err
    print("KERNEL_OK")
</pallas_src>

<mosaic_0001>
module attributes {stable_mosaic.version = 11 : i64} {
  func.func @_gru_cell_kernel(%arg0: i32, %arg1: memref<16x128xbf16, #tpu.memory_space<vmem>>, %arg2: memref<16x256xf32, #tpu.memory_space<vmem>>, %arg3: memref<128x768xbf16, #tpu.memory_space<vmem>>, %arg4: memref<256x768xbf16, #tpu.memory_space<vmem>>, %arg5: memref<1x768xf32, #tpu.memory_space<vmem>>, %arg6: memref<1x256xf32, #tpu.memory_space<vmem>>, %arg7: memref<16x256xf32, #tpu.memory_space<vmem>>) attributes {dimension_semantics = [#tpu.dimension_semantics<parallel>], iteration_bounds = array<i64: 1>, scalar_prefetch = 0 : i64, scratch_operands = 0 : i64, tpu.core_type = #tpu.core_type<tc>, window_params = [{transform_indices = @transform_0, window_bounds = array<i64: 16, 128>}, {transform_indices = @transform_1, window_bounds = array<i64: 16, 256>}, {pipeline_mode = #tpu.pipeline_mode<synchronous>, transform_indices = @transform_2, window_bounds = array<i64: 128, 768>}, {pipeline_mode = #tpu.pipeline_mode<synchronous>, transform_indices = @transform_3, window_bounds = array<i64: 256, 768>}, {pipeline_mode = #tpu.pipeline_mode<synchronous>, transform_indices = @transform_4, window_bounds = array<i64: 1, 768>}, {pipeline_mode = #tpu.pipeline_mode<synchronous>, transform_indices = @transform_5, window_bounds = array<i64: 1, 256>}, {transform_indices = @transform_6, window_bounds = array<i64: 16, 256>}]} {
    %c0 = arith.constant 0 : index
    %c0_0 = arith.constant 0 : index
    %0 = vector.load %arg1[%c0, %c0_0] : memref<16x128xbf16, #tpu.memory_space<vmem>>, vector<16x128xbf16>
    %c0_1 = arith.constant 0 : index
    %c0_2 = arith.constant 0 : index
    %1 = vector.load %arg2[%c0_1, %c0_2] : memref<16x256xf32, #tpu.memory_space<vmem>>, vector<16x256xf32>
    %c0_3 = arith.constant 0 : index
    %c0_4 = arith.constant 0 : index
    %2 = vector.load %arg3[%c0_3, %c0_4] : memref<128x768xbf16, #tpu.memory_space<vmem>>, vector<128x768xbf16>
    %cst = arith.constant dense<0.000000e+00> : vector<16x768xf32>
    %3 = tpu.matmul %0, %2, %cst {dimension_numbers = #tpu.dot_dimension_numbers<[1], [0], [0], [1], [0, 0, 1, 1], [], []>} : vector<16x128xbf16>, vector<128x768xbf16>, vector<16x768xf32> -> vector<16x768xf32>
    %4 = arith.truncf %1 : vector<16x256xf32> to vector<16x256xbf16>
    %c0_5 = arith.constant 0 : index
    %c0_6 = arith.constant 0 : index
    %5 = vector.load %arg4[%c0_5, %c0_6] : memref<256x768xbf16, #tpu.memory_space<vmem>>, vector<256x768xbf16>
    %cst_7 = arith.constant dense<0.000000e+00> : vector<16x768xf32>
    %6 = tpu.matmul %4, %5, %cst_7 {dimension_numbers = #tpu.dot_dimension_numbers<[1], [0], [0], [1], [0, 0, 1, 1], [], []>} : vector<16x256xbf16>, vector<256x768xbf16>, vector<16x768xf32> -> vector<16x768xf32>
    %7 = vector.extract_strided_slice %3 {offsets = [0, 0], sizes = [16, 512], strides = [1, 1]} : vector<16x768xf32> to vector<16x512xf32>
    %8 = vector.extract_strided_slice %6 {offsets = [0, 0], sizes = [16, 512], strides = [1, 1]} : vector<16x768xf32> to vector<16x512xf32>
    %9 = arith.addf %7, %8 : vector<16x512xf32>
    %c0_8 = arith.constant 0 : index
    %c0_9 = arith.constant 0 : index
    %10 = vector.load %arg5[%c0_8, %c0_9] : memref<1x768xf32, #tpu.memory_space<vmem>>, vector<1x512xf32>
    %11 = vector.broadcast %10 : vector<1x512xf32> to vector<16x512xf32>
    %12 = arith.addf %9, %11 : vector<16x512xf32>
    %cst_10 = arith.constant 5.000000e-01 : f32
    %13 = vector.broadcast %cst_10 : f32 to vector<16x512xf32>
    %14 = arith.mulf %13, %12 : vector<16x512xf32>
    %15 = math.tanh %14 : vector<16x512xf32>
    %cst_11 = arith.constant 5.000000e-01 : f32
    %16 = vector.broadcast %cst_11 : f32 to vector<16x512xf32>
    %17 = arith.mulf %16, %15 : vector<16x512xf32>
    %cst_12 = arith.constant 5.000000e-01 : f32
    %18 = vector.broadcast %cst_12 : f32 to vector<16x512xf32>
    %19 = arith.addf %18, %17 : vector<16x512xf32>
    %20 = vector.extract_strided_slice %19 {offsets = [0, 0], sizes = [16, 128], strides = [1, 1]} : vector<16x512xf32> to vector<16x128xf32>
    %21 = vector.extract_strided_slice %19 {offsets = [0, 128], sizes = [16, 128], strides = [1, 1]} : vector<16x512xf32> to vector<16x128xf32>
    %22 = vector.extract_strided_slice %19 {offsets = [0, 256], sizes = [16, 128], strides = [1, 1]} : vector<16x512xf32> to vector<16x128xf32>
    %23 = vector.extract_strided_slice %19 {offsets = [0, 384], sizes = [16, 128], strides = [1, 1]} : vector<16x512xf32> to vector<16x128xf32>
    %24 = vector.extract_strided_slice %3 {offsets = [0, 512], sizes = [16, 256], strides = [1, 1]} : vector<16x768xf32> to vector<16x256xf32>
    %c0_13 = arith.constant 0 : index
    %c512 = arith.constant 512 : index
    %25 = vector.load %arg5[%c0_13, %c512] : memref<1x768xf32, #tpu.memory_space<vmem>>, vector<1x256xf32>
    %26 = vector.broadcast %25 : vector<1x256xf32> to vector<16x256xf32>
    %27 = arith.addf %24, %26 : vector<16x256xf32>
    %28 = vector.extract_strided_slice %6 {offsets = [0, 512], sizes = [16, 256], strides = [1, 1]} : vector<16x768xf32> to vector<16x256xf32>
    %c0_14 = arith.constant 0 : index
    %c0_15 = arith.constant 0 : index
    %29 = vector.load %arg6[%c0_14, %c0_15] : memref<1x256xf32, #tpu.memory_space<vmem>>, vector<1x256xf32>
    %30 = vector.broadcast %29 : vector<1x256xf32> to vector<16x256xf32>
    %31 = arith.addf %28, %30 : vector<16x256xf32>
    %32 = vector.extract_strided_slice %31 {offsets = [0, 0], sizes = [16, 128], strides = [1, 1]} : vector<16x256xf32> to vector<16x128xf32>
    %33 = vector.extract_strided_slice %31 {offsets = [0, 128], sizes = [16, 128], strides = [1, 1]} : vector<16x256xf32> to vector<16x128xf32>
    %34 = vector.extract_strided_slice %27 {offsets = [0, 0], sizes = [16, 128], strides = [1, 1]} : vector<16x256xf32> to vector<16x128xf32>
    %35 = arith.mulf %20, %32 : vector<16x128xf32>
    %36 = arith.addf %34, %35 : vector<16x128xf32>
    %37 = arith.mulf %21, %33 : vector<16x128xf32>
    %38 = arith.subf %36, %37 : vector<16x128xf32>
    %39 = math.tanh %38 : vector<16x128xf32>
    %40 = vector.extract_strided_slice %27 {offsets = [0, 128], sizes = [16, 128], strides = [1, 1]} : vector<16x256xf32> to vector<16x128xf32>
    %41 = arith.mulf %20, %33 : vector<16x128xf32>
    %42 = arith.addf %40, %41 : vector<16x128xf32>
    %43 = arith.mulf %21, %32 : vector<16x128xf32>
    %44 = arith.addf %42, %43 : vector<16x128xf32>
    %45 = math.tanh %44 : vector<16x128xf32>
    %46 = vector.extract_strided_slice %1 {offsets = [0, 0], sizes = [16, 128], strides = [1, 1]} : vector<16x256xf32> to vector<16x128xf32>
    %47 = vector.extract_strided_slice %1 {offsets = [0, 128], sizes = [16, 128], strides = [1, 1]} : vector<16x256xf32> to vector<16x128xf32>
    %cst_16 = arith.constant 1.000000e+00 : f32
    %48 = vector.broadcast %cst_16 : f32 to vector<16x128xf32>
    %49 = arith.subf %48, %22 : vector<16x128xf32>
    %50 = arith.mulf %49, %39 : vector<16x128xf32>
    %51 = arith.mulf %23, %45 : vector<16x128xf32>
    %52 = arith.addf %50, %51 : vector<16x128xf32>
    %53 = arith.mulf %22, %46 : vector<16x128xf32>
    %54 = arith.addf %52, %53 : vector<16x128xf32>
    %55 = arith.mulf %23, %47 : vector<16x128xf32>
    %56 = arith.subf %54, %55 : vector<16x128xf32>
    %c0_17 = arith.constant 0 : index
    %c0_18 = arith.constant 0 : index
    %57 = vector.load %arg7[%c0_17, %c0_18] : memref<16x256xf32, #tpu.memory_space<vmem>>, vector<16x128xf32>
    tpu.vector_store %arg7[%c0_17, %c0_18], %56 {strides = array<i32>} : memref<16x256xf32, #tpu.memory_space<vmem>>, vector<16x128xf32>,
    %cst_19 = arith.constant 1.000000e+00 : f32
    %58 = vector.broadcast %cst_19 : f32 to vector<16x128xf32>
    %59 = arith.subf %58, %22 : vector<16x128xf32>
    %60 = arith.mulf %59, %45 : vector<16x128xf32>
    %61 = arith.mulf %23, %39 : vector<16x128xf32>
    %62 = arith.subf %60, %61 : vector<16x128xf32>
    %63 = arith.mulf %22, %47 : vector<16x128xf32>
    %64 = arith.addf %62, %63 : vector<16x128xf32>
    %65 = arith.mulf %23, %46 : vector<16x128xf32>
    %66 = arith.addf %64, %65 : vector<16x128xf32>
    %c0_20 = arith.constant 0 : index
    %c128 = arith.constant 128 : index
    %67 = vector.load %arg7[%c0_20, %c128] : memref<16x256xf32, #tpu.memory_space<vmem>>, vector<16x128xf32>
    tpu.vector_store %arg7[%c0_20, %c128], %66 {strides = array<i32>} : memref<16x256xf32, #tpu.memory_space<vmem>>, vector<16x128xf32>,
    return
  }
  func.func @transform_0(%arg0: i32) -> (i32, i32) {
    %c0_i32 = arith.constant 0 : i32
    %c0_i32_0 = arith.constant 0 : i32
    return %arg0, %c0_i32 : i32, i32
  }
  func.func @transform_1(%arg0: i32) -> (i32, i32) {
    %c0_i32 = arith.constant 0 : i32
    %c0_i32_0 = arith.constant 0 : i32
    return %arg0, %c0_i32 : i32, i32
  }
  func.func @transform_2(%arg0: i32) -> (i32, i32) {
    %c0_i32 = arith.constant 0 : i32
    %c0_i32_0 = arith.constant 0 : i32
    %c0_i32_1 = arith.constant 0 : i32
    return %c0_i32, %c0_i32_0 : i32, i32
  }
  func.func @transform_3(%arg0: i32) -> (i32, i32) {
    %c0_i32 = arith.constant 0 : i32
    %c0_i32_0 = arith.constant 0 : i32
    %c0_i32_1 = arith.constant 0 : i32
    return %c0_i32, %c0_i32_0 : i32, i32
  }
  func.func @transform_4(%arg0: i32) -> (i32, i32) {
    %c0_i32 = arith.constant 0 : i32
    %c0_i32_0 = arith.constant 0 : i32
    %c0_i32_1 = arith.constant 0 : i32
    return %c0_i32, %c0_i32_0 : i32, i32
  }
  func.func @transform_5(%arg0: i32) -> (i32, i32) {
    %c0_i32 = arith.constant 0 : i32
    %c0_i32_0 = arith.constant 0 : i32
    %c0_i32_1 = arith.constant 0 : i32
    return %c0_i32, %c0_i32_0 : i32, i32
  }
  func.func @transform_6(%arg0: i32) -> (i32, i32) {
    %c0_i32 = arith.constant 0 : i32
    %c0_i32_0 = arith.constant 0 : i32
    return %arg0, %c0_i32 : i32, i32
  }
}

</mosaic_0001>

<bundles_post_ra>
// kernel: tpu_custom_call.1
= control target key start
LH: loop header
LB: loop body
LE: loop exit
PB: predicated region body
PF: predicated region fallthrough
CT: control target
= control target key end

     0   :  { %11 = vsyncpa [#allocation3], 0  ;;  %s2087_s0 = inlined_call_operand.hbm [shape: bf16[16,128], index: 0, kind: input, shape index: {}]   ;;  %s2088_s1 = inlined_call_operand.hbm [shape: f32[16,256], index: 1, kind: input, shape index: {}]   ;;  %s2089_s2 = inlined_call_operand.hbm [shape: bf16[128,768], index: 2, kind: input, shape index: {}]   ;;  %s2090_s3 = inlined_call_operand.hbm [shape: bf16[256,768], index: 3, kind: input, shape index: {}]   ;;  %s2091_s4 = inlined_call_operand.vmem [shape: f32[1,768], index: 4, kind: input, shape index: {}]   ;;  %s2092_s5 = inlined_call_operand.vmem [shape: f32[1,256], index: 5, kind: input, shape index: {}]   ;;  %s2093_s6 = inlined_call_operand.hbm [shape: f32[16,256], index: 6, kind: output, shape index: {}]  }
   0x1   :  { %12 = vsyncpa [#allocation6], 0 }
   0x2   :  { %13 = vsyncpa [#allocation9], 0 }
   0x3   :  { %14 = vsyncpa [#allocation4], 0  ;;  %s1915_s21 = smov [#allocation5]   ;;  %s1797_s25 = scalar_lea.hbm %s2088_s1, 512 }
   0x4   :  { %s32_s22 = sshll.u32 %s1915_s21, 4  ;;  %p1798_p0 = scmp.ne.s32.totalorder %s2088_s1, %s1797_s25  ;;  %s33_s22 = int_to_ptr.vmem [resolvable:$true] %s32_s22 }
   0x5   :  { %p1801_p1 = scmp.lt.u32.totalorder %s1797_s25, %s2088_s1 }
   0x7   :  { %p1803_p2 = pnand %p1801_p1, %p1798_p0 }
   0x9   :  { %1806 = shalt.err (!%p1803_p2)
}
   0xa   :  { %s1807_s30 = scalar_lea.vmem %s33_s22, 512  ;;  %p1812_p4 = scmp.lt.s32.totalorder %s33_s22, %s33_s22 }
   0xb   :  { %p1808_p3 = scmp.ne.s32.totalorder %s33_s22, %s1807_s30  ;;  %p1813_p5 = scmp.lt.s32.totalorder %s1807_s30, %s1807_s30 }
   0xd   :  { %p1814_p6 = por %p1813_p5, %p1812_p4 }
   0xf   :  { %p1815_p7 = pnand %p1814_p6, %p1808_p3 }
  0x11   :  { %1818 = shalt.err (!%p1815_p7)
}
  0x12   :  { %s1916_s7 = smov 256   ;;  %s1917_s8 = smov 16  }
  0x13   :  { %38 = dma.hbm_to_vmem [thread:$0]  %s2088_s1, 512, %s33_s22, [#allocation6], %s1916_s7, %s1916_s7, %s1917_s8  }
  0x14   :  { %s1918_s11 = smov [#allocation2]   ;;  %s1819_s15 = scalar_lea.hbm %s2087_s0, 128 }
  0x15   :  { %s20_s12 = sshll.u32 %s1918_s11, 4  ;;  %p1820_p8 = scmp.ne.s32.totalorder %s2087_s0, %s1819_s15  ;;  %s21_s12 = int_to_ptr.vmem [resolvable:$true] %s20_s12 }
  0x16   :  { %p1823_p9 = scmp.lt.u32.totalorder %s1819_s15, %s2087_s0 }
  0x18   :  { %p1825_p10 = pnand %p1823_p9, %p1820_p8 }
  0x1a   :  { %1828 = shalt.err (!%p1825_p10)
}
  0x1b   :  { %s1829_s20 = scalar_lea.vmem %s21_s12, 128  ;;  %p1834_p12 = scmp.lt.s32.totalorder %s21_s12, %s21_s12 }
  0x1c   :  { %p1830_p11 = scmp.ne.s32.totalorder %s21_s12, %s1829_s20  ;;  %p1835_p13 = scmp.lt.s32.totalorder %s1829_s20, %s1829_s20 }
  0x1e   :  { %p1836_p0 = por %p1835_p13, %p1834_p12 }
  0x20   :  { %p1837_p1 = pnand %p1836_p0, %p1830_p11 }
  0x22   :  { %1840 = shalt.err (!%p1837_p1)
}
  0x23   :  { %s1919_s1 = smov 64   ;;  %s1920_s21 = smov 4  }
  0x24   :  { %26 = dma.hbm_to_vmem [thread:$0]  %s2087_s0, 128, %s21_s12, [#allocation3], %s1919_s1, %s1919_s1, %s1920_s21  }
  0x25   :  { %s1921_s24 = smov [#allocation7]   ;;  %s1841_s28 = scalar_lea.hbm %s2089_s2, 6144 }
  0x26   :  { %s44_s25 = sshll.u32 %s1921_s24, 4  ;;  %p1842_p2 = scmp.ne.s32.totalorder %s2089_s2, %s1841_s28  ;;  %s45_s25 = int_to_ptr.vmem [resolvable:$true] %s44_s25 }
  0x27   :  { %p1845_p3 = scmp.lt.u32.totalorder %s1841_s28, %s2089_s2 }
  0x29   :  { %p1847_p4 = pnand %p1845_p3, %p1842_p2 }
  0x2b   :  { %1850 = shalt.err (!%p1847_p4)
}
  0x2c   :  { %s1851_s11 = scalar_lea.vmem %s45_s25, 6144  ;;  %p1856_p6 = scmp.lt.s32.totalorder %s45_s25, %s45_s25 }
  0x2d   :  { %p1852_p5 = scmp.ne.s32.totalorder %s45_s25, %s1851_s11  ;;  %p1857_p7 = scmp.lt.s32.totalorder %s1851_s11, %s1851_s11 }
  0x2f   :  { %p1858_p8 = por %p1857_p7, %p1856_p6 }
  0x31   :  { %p1859_p9 = pnand %p1858_p8, %p1852_p5 }
  0x33   :  { %1862 = shalt.err (!%p1859_p9)
}
  0x34   :  { %s1922_s0 = smov 384   ;;  %s1923_s12 = smov 24  }
  0x35   :  { %50 = dma.hbm_to_vmem [thread:$0]  %s2089_s2, 6144, %s45_s25, [#allocation6], %s1922_s0, %s1922_s0, %s1923_s12  }
  0x36   :  { %s1924_s15 = smov [#allocation8]   ;;  %s1863_s19 = scalar_lea.hbm %s2090_s3, 12288 }
  0x37   :  { %s56_s16 = sshll.u32 %s1924_s15, 4  ;;  %p1864_p10 = scmp.ne.s32.totalorder %s2090_s3, %s1863_s19  ;;  %s57_s16 = int_to_ptr.vmem [resolvable:$true] %s56_s16 }
  0x38   :  { %p1867_p11 = scmp.lt.u32.totalorder %s1863_s19, %s2090_s3 }
  0x3a   :  { %p1869_p12 = pnand %p1867_p11, %p1864_p10 }
  0x3c   :  { %1872 = shalt.err (!%p1869_p12)
}
  0x3d   :  { %s1873_s23 = scalar_lea.vmem %s57_s16, 12288  ;;  %p1878_p0 = scmp.lt.s32.totalorder %s57_s16, %s57_s16 }
  0x3e   :  { %p1874_p13 = scmp.ne.s32.totalorder %s57_s16, %s1873_s23  ;;  %p1879_p1 = scmp.lt.s32.totalorder %s1873_s23, %s1873_s23 }
  0x40   :  { %p1880_p2 = por %p1879_p1, %p1878_p0 }
  0x42   :  { %p1881_p3 = pnand %p1880_p2, %p1874_p13 }
  0x44   :  { %1884 = shalt.err (!%p1881_p3)
}
  0x45   :  { %62 = dma.hbm_to_vmem [thread:$0]  %s2090_s3, 12288, %s57_s16, [#allocation9], %s1922_s0, %s1922_s0, %s1923_s12  }
  0x46   :  { %1907 = dma.done.wait [#allocation3], 128  }
  0x47   :  { %1908 = vsyncadd [#allocation3], 4294967168 }
  0x48   :  { %1909 = dma.done.wait [#allocation6], 6656  }
  0x49   :  { %1910 = vsyncadd [#allocation6], 4294960640 }
  0x4a   :  { %1911 = dma.done.wait [#allocation9], 12288  }
  0x4b   :  { %1912 = vsyncadd [#allocation9], 4294955008  ;;  %v1925_v0 = vmov 0   ;;  %v1556_v1 = vld [vmem:[#allocation7 + $0x4] ss:$24 sps:$4 sm:$0xff]  }
  0x4c   :  { %412 = vmatprep.mubr.bf16.mxu0 %v1925_v0  ;;  %455 = vmatprep.mubr.bf16.mxu1 %v1925_v0  ;;  %v1558_v2 = vld [vmem:[#allocation7 + $0xc] ss:$24 sps:$4 sm:$0xff]   ;;  %v1560_v3 = vld [vmem:[#allocation7] ss:$24 sps:$4 sm:$0xff]   ;;  %v1564_v6 = vld [vmem:[#allocation7 + $0x3c] ss:$24 sps:$4 sm:$0xff]  }
  0x4d   :  { %380 = vmatprep.subr.bf16.mxu0 %v1556_v1  ;;  %v1561_v4 = vld [vmem:[#allocation7 + $0x8] ss:$24 sps:$4 sm:$0xff]   ;;  %423 = vmatprep.subr.bf16.mxu1 %v1558_v2  ;;  %v1562_v5 = vld [vmem:[#allocation7 + $0x34] ss:$24 sps:$4 sm:$0xff]   ;;  %v1567_v8 = vld [vmem:[#allocation7 + $0x38] ss:$24 sps:$4 sm:$0xff]  }
  0x4e   :  { %381 = vmatpush1.bf16.msra.mxu0 %v1560_v3  ;;  %424 = vmatpush1.bf16.msra.mxu1 %v1561_v4  ;;  %v1566_v7 = vld [vmem:[#allocation7 + $0x30] ss:$24 sps:$4 sm:$0xff]   ;;  %v1568_v9 = vld [vmem:[#allocation7 + $0x64] ss:$24 sps:$4 sm:$0xff]   ;;  %v1572_v11 = vld [vmem:[#allocation7 + $0x60] ss:$24 sps:$4 sm:$0xff]  }
  0x4f   :  { %382 = vmatprep.subr.bf16.mxu0 %v1562_v5  ;;  %425 = vmatprep.subr.bf16.mxu1 %v1564_v6  ;;  %v1570_v10 = vld [vmem:[#allocation7 + $0x6c] ss:$24 sps:$4 sm:$0xff]   ;;  %v1573_v12 = vld [vmem:[#allocation7 + $0x68] ss:$24 sps:$4 sm:$0xff]   ;;  %v1576_v14 = vld [vmem:[#allocation7 + $0x9c] ss:$24 sps:$4 sm:$0xff]  }
  0x50   :  { %v1574_v13 = vld [vmem:[#allocation7 + $0x94] ss:$24 sps:$4 sm:$0xff]   ;;  %v1578_v15 = vld [vmem:[#allocation7 + $0x90] ss:$24 sps:$4 sm:$0xff]   ;;  %v1580_v17 = vld [vmem:[#allocation7 + $0xc4] ss:$24 sps:$4 sm:$0xff]  }
  0x51   :  { %v1579_v16 = vld [vmem:[#allocation7 + $0x98] ss:$24 sps:$4 sm:$0xff]   ;;  %v1582_v18 = vld [vmem:[#allocation7 + $0xcc] ss:$24 sps:$4 sm:$0xff]   ;;  %v1585_v20 = vld [vmem:[#allocation7 + $0xc8] ss:$24 sps:$4 sm:$0xff]  }
  0x52   :  { %383 = vmatpush1.bf16.msra.mxu0 %v1566_v7  ;;  %426 = vmatpush1.bf16.msra.mxu1 %v1567_v8  ;;  %v1584_v19 = vld [vmem:[#allocation7 + $0xc0] ss:$24 sps:$4 sm:$0xff]   ;;  %v1586_v21 = vld [vmem:[#allocation7 + $0xf4] ss:$24 sps:$4 sm:$0xff]   ;;  %v1590_v23 = vld [vmem:[#allocation7 + $0xf0] ss:$24 sps:$4 sm:$0xff]  }
  0x53   :  { %384 = vmatprep.subr.bf16.mxu0 %v1568_v9  ;;  %427 = vmatprep.subr.bf16.mxu1 %v1570_v10  ;;  %v1588_v22 = vld [vmem:[#allocation7 + $0xfc] ss:$24 sps:$4 sm:$0xff]   ;;  %v1591_v24 = vld [vmem:[#allocation7 + $0xf8] ss:$24 sps:$4 sm:$0xff]   ;;  %v1594_v26 = vld [vmem:[#allocation7 + $0x12c] ss:$24 sps:$4 sm:$0xff]  }
  0x54   :  { %v1592_v25 = vld [vmem:[#allocation7 + $0x124] ss:$24 sps:$4 sm:$0xff]   ;;  %v1596_v27 = vld [vmem:[#allocation7 + $0x120] ss:$24 sps:$4 sm:$0xff]   ;;  %v1598_v29 = vld [vmem:[#allocation7 + $0x154] ss:$24 sps:$4 sm:$0xff]  }
  0x55   :  { %v1597_v28 = vld [vmem:[#allocation7 + $0x128] ss:$24 sps:$4 sm:$0xff]   ;;  %v1600_v30 = vld [vmem:[#allocation7 + $0x15c] ss:$24 sps:$4 sm:$0xff]   ;;  %v1603_v32 = vld [vmem:[#allocation7 + $0x158] ss:$24 sps:$4 sm:$0xff]  }
  0x56   :  { %385 = vmatpush1.bf16.msra.mxu0 %v1572_v11  ;;  %428 = vmatpush1.bf16.msra.mxu1 %v1573_v12  ;;  %v1602_v31 = vld [vmem:[#allocation7 + $0x150] ss:$24 sps:$4 sm:$0xff]   ;;  %v1606_v33 = vld [vmem:[#allocation7 + $0x14] ss:$24 sps:$4 sm:$0xff]   ;;  %v2015_v36 = vld [vmem:[#allocation2] sm:$0xff]  }
  0x57   :  { %386 = vmatprep.subr.bf16.mxu0 %v1574_v13  ;;  %429 = vmatprep.subr.bf16.mxu1 %v1576_v14  ;;  %v1609_v34 = vld [vmem:[#allocation8 + $0xc] ss:$24 sps:$4 sm:$0xff]   ;;  %v1604_v35 = vld [vmem:[#allocation7 + $0x10] ss:$24 sps:$4 sm:$0xff]   ;;  %v1616_v39 = vld [vmem:[#allocation8 + $0x3c] ss:$24 sps:$4 sm:$0xff]  }
  0x58   :  { %v1607_v37 = vld [vmem:[#allocation8 + $0x8] ss:$24 sps:$4 sm:$0xff]   ;;  %v1613_v38 = vld [vmem:[#allocation7 + $0x44] ss:$24 sps:$4 sm:$0xff]   ;;  %v1614_v41 = vld [vmem:[#allocation8 + $0x38] ss:$24 sps:$4 sm:$0xff]  }
  0x59   :  { %v1611_v40 = vld [vmem:[#allocation7 + $0x40] ss:$24 sps:$4 sm:$0xff]   ;;  %v1619_v42 = vld [vmem:[#allocation7 + $0x74] ss:$24 sps:$4 sm:$0xff]   ;;  %v1617_v44 = vld [vmem:[#allocation7 + $0x70] ss:$24 sps:$4 sm:$0xff]  }
  0x5a   :  { %387 = vmatpush1.bf16.msra.mxu0 %v1578_v15  ;;  %430 = vmatpush1.bf16.msra.mxu1 %v1579_v16  ;;  %v1622_v43 = vld [vmem:[#allocation8 + $0x6c] ss:$24 sps:$4 sm:$0xff]   ;;  %v1620_v45 = vld [vmem:[#allocation8 + $0x68] ss:$24 sps:$4 sm:$0xff]   ;;  %v1628_v47 = vld [vmem:[#allocation8 + $0x9c] ss:$24 sps:$4 sm:$0xff]  }
  0x5b   :  { %388 = vmatprep.subr.bf16.mxu0 %v1580_v17  ;;  %431 = vmatprep.subr.bf16.mxu1 %v1582_v18  ;;  %v1625_v46 = vld [vmem:[#allocation7 + $0xa4] ss:$24 sps:$4 sm:$0xff]   ;;  %v1623_v48 = vld [vmem:[#allocation7 + $0xa0] ss:$24 sps:$4 sm:$0xff]   ;;  %v1631_v50 = vld [vmem:[#allocation7 + $0xd4] ss:$24 sps:$4 sm:$0xff]  }
  0x5c   :  { %v1626_v49 = vld [vmem:[#allocation8 + $0x98] ss:$24 sps:$4 sm:$0xff]   ;;  %v1634_v51 = vld [vmem:[#allocation8 + $0xcc] ss:$24 sps:$4 sm:$0xff]   ;;  %v1632_v53 = vld [vmem:[#allocation8 + $0xc8] ss:$24 sps:$4 sm:$0xff]  }
  0x5d   :  { %v1629_v52 = vld [vmem:[#allocation7 + $0xd0] ss:$24 sps:$4 sm:$0xff]   ;;  %v1637_v54 = vld [vmem:[#allocation7 + $0x104] ss:$24 sps:$4 sm:$0xff]   ;;  %v1635_v56 = vld [vmem:[#allocation7 + $0x100] ss:$24 sps:$4 sm:$0xff]  }
  0x5e   :  { %389 = vmatpush1.bf16.msra.mxu0 %v1584_v19  ;;  %432 = vmatpush1.bf16.msra.mxu1 %v1585_v20  ;;  %v1640_v55 = vld [vmem:[#allocation8 + $0xfc] ss:$24 sps:$4 sm:$0xff]   ;;  %v1638_v57 = vld [vmem:[#allocation8 + $0xf8] ss:$24 sps:$4 sm:$0xff]   ;;  %v1646_v59 = vld [vmem:[#allocation8 + $0x12c] ss:$24 sps:$4 sm:$0xff]  }
  0x5f   :  { %390 = vmatprep.subr.bf16.mxu0 %v1586_v21  ;;  %433 = vmatprep.subr.bf16.mxu1 %v1588_v22  ;;  %v1643_v58 = vld [vmem:[#allocation7 + $0x134] ss:$24 sps:$4 sm:$0xff]   ;;  %v1641_v60 = vld [vmem:[#allocation7 + $0x130] ss:$24 sps:$4 sm:$0xff]   ;;  %v1649_v62 = vld [vmem:[#allocation7 + $0x164] ss:$24 sps:$4 sm:$0xff]  }
  0x60   :  { %v1644_v61 = vld [vmem:[#allocation8 + $0x128] ss:$24 sps:$4 sm:$0xff]   ;;  %v1652_v63 = vld [vmem:[#allocation8 + $0x15c] ss:$24 sps:$4 sm:$0xff]   ;;  %v1650_v1 = vld [vmem:[#allocation8 + $0x158] ss:$24 sps:$4 sm:$0xff]  }
  0x61   :  { %v1655_v2 = vld [vmem:[#allocation8 + $0x4] ss:$24 sps:$4 sm:$0xff]   ;;  %v1653_v4 = vld [vmem:[#allocation8] ss:$24 sps:$4 sm:$0xff]   ;;  %v1661_v6 = vld [vmem:[#allocation8 + $0x34] ss:$24 sps:$4 sm:$0xff]  }
  0x62   :  { %391 = vmatpush1.bf16.msra.mxu0 %v1590_v23  ;;  %434 = vmatpush1.bf16.msra.mxu1 %v1591_v24  ;;  %v1658_v3 = vld [vmem:[#allocation8 + $0x18c] ss:$24 sps:$4 sm:$0xff]   ;;  %v1656_v5 = vld [vmem:[#allocation8 + $0x188] ss:$24 sps:$4 sm:$0xff]   ;;  %v1664_v7 = vld [vmem:[#allocation8 + $0x1bc] ss:$24 sps:$4 sm:$0xff]  }
  0x63   :  { %392 = vmatprep.subr.bf16.mxu0 %v1592_v25  ;;  %435 = vmatprep.subr.bf16.mxu1 %v1594_v26  ;;  %v2020_v8 = vld [vmem:[#allocation5 + $0x8] sm:$0xff]  ;;  %v2022_v9 = vld [vmem:[#allocation5 + $0x18] sm:$0xff] }
  0x64   :  { %v2026_v10 = vpack.c.bf16 %v2022_v9, %v2020_v8  ;;  %v1659_v11 = vld [vmem:[#allocation8 + $0x30] ss:$24 sps:$4 sm:$0xff]   ;;  %v1667_v13 = vld [vmem:[#allocation8 + $0x64] ss:$24 sps:$4 sm:$0xff]   ;;  %v1665_v15 = vld [vmem:[#allocation8 + $0x60] ss:$24 sps:$4 sm:$0xff]  }
  0x65   :  { %v1662_v12 = vld [vmem:[#allocation8 + $0x1b8] ss:$24 sps:$4 sm:$0xff]   ;;  %v1670_v14 = vld [vmem:[#allocation8 + $0x1ec] ss:$24 sps:$4 sm:$0xff]   ;;  %v1668_v16 = vld [vmem:[#allocation8 + $0x1e8] ss:$24 sps:$4 sm:$0xff]  }
  0x66   :  { %393 = vmatpush1.bf16.msra.mxu0 %v1596_v27  ;;  %436 = vmatpush1.bf16.msra.mxu1 %v1597_v28  ;;  %v1673_v17 = vld [vmem:[#allocation8 + $0x94] ss:$24 sps:$4 sm:$0xff]   ;;  %v1671_v19 = vld [vmem:[#allocation8 + $0x90] ss:$24 sps:$4 sm:$0xff]   ;;  %v1679_v21 = vld [vmem:[#allocation8 + $0xc4] ss:$24 sps:$4 sm:$0xff]  }
  0x67   :  { %394 = vmatprep.subr.bf16.mxu0 %v1598_v29  ;;  %437 = vmatprep.subr.bf16.mxu1 %v1600_v30  ;;  %v1676_v18 = vld [vmem:[#allocation8 + $0x21c] ss:$24 sps:$4 sm:$0xff]   ;;  %v1674_v20 = vld [vmem:[#allocation8 + $0x218] ss:$24 sps:$4 sm:$0xff]   ;;  %v1682_v22 = vld [vmem:[#allocation8 + $0x24c] ss:$24 sps:$4 sm:$0xff]  }
  0x68   :  { %v1677_v23 = vld [vmem:[#allocation8 + $0xc0] ss:$24 sps:$4 sm:$0xff]   ;;  %v1685_v25 = vld [vmem:[#allocation8 + $0xf4] ss:$24 sps:$4 sm:$0xff]   ;;  %v1683_v27 = vld [vmem:[#allocation8 + $0xf0] ss:$24 sps:$4 sm:$0xff]  }
  0x69   :  { %v1680_v24 = vld [vmem:[#allocation8 + $0x248] ss:$24 sps:$4 sm:$0xff]   ;;  %v1688_v26 = vld [vmem:[#allocation8 + $0x27c] ss:$24 sps:$4 sm:$0xff]   ;;  %v1686_v28 = vld [vmem:[#allocation8 + $0x278] ss:$24 sps:$4 sm:$0xff]  }
  0x6a   :  { %395 = vmatpush1.bf16.msra.mxu0 %v1602_v31  ;;  %438 = vmatpush1.bf16.msra.mxu1 %v1603_v32  ;;  %v1691_v29 = vld [vmem:[#allocation8 + $0x124] ss:$24 sps:$4 sm:$0xff]   ;;  %v1689_v31 = vld [vmem:[#allocation8 + $0x120] ss:$24 sps:$4 sm:$0xff]  }
  0x6b   :  { %466 = vmatprep.subr.bf16.mxu0 %v1606_v33  ;;  %1130 = vmatprep.subr.bf16.mxu1 %v1609_v34  ;;  %v1694_v30 = vld [vmem:[#allocation8 + $0x2ac] ss:$24 sps:$4 sm:$0xff]   ;;  %v1692_v32 = vld [vmem:[#allocation8 + $0x2a8] ss:$24 sps:$4 sm:$0xff]   ;;  %v1700_v34 = vld [vmem:[#allocation8 + $0x2dc] ss:$24 sps:$4 sm:$0xff]  }
  0x6c   :  { %v1697_v33 = vld [vmem:[#allocation8 + $0x154] ss:$24 sps:$4 sm:$0xff]  }
  0x6d   :  { %413 = vmatmul.mubr.bf16.vlgmr.msra.gmra.mrb[0].mxu0 %v2015_v36  ;;  %456 = vmatmul.mubr.bf16.vlgmr.msra.gmra.mrb[0].mxu1 %v2015_v36 }
  0x6e   :  { %467 = vmatpush1.bf16.msra.mxu0 %v1604_v35  ;;  %1131 = vmatpush1.bf16.msra.mxu1 %v1607_v37  ;;  %v1695_v35 = vld [vmem:[#allocation8 + $0x150] ss:$24 sps:$4 sm:$0xff]   ;;  %v1703_v37 = vld [vmem:[#allocation8 + $0x184] ss:$24 sps:$4 sm:$0xff]  }
  0x6f   :  { %468 = vmatprep.subr.bf16.mxu0 %v1613_v38  ;;  %1132 = vmatprep.subr.bf16.mxu1 %v1616_v39  ;;  %v2031_v38 = vld [vmem:[#allocation5] sm:$0xff]  ;;  %v2033_v39 = vld [vmem:[#allocation5 + $0x10] sm:$0xff] }
  0x70   :  { %498 = vmatprep.mubr.bf16.mxu0 %v1925_v0  ;;  %v1647_v0 = vld [vmem:[#allocation7 + $0x160] ss:$24 sps:$4 sm:$0xff]   ;;  %1162 = vmatprep.mubr.bf16.mxu1 %v2026_v10 }
  0x72   :  { %469 = vmatpush1.bf16.msra.mxu0 %v1611_v40  ;;  %1133 = vmatpush1.bf16.msra.mxu1 %v1614_v41  ;;  %v1706_v40 = vld [vmem:[#allocation8 + $0x14] ss:$24 sps:$4 sm:$0xff]   ;;  %v1701_v41 = vld [vmem:[#allocation8 + $0x180] ss:$24 sps:$4 sm:$0xff]  }
  0x73   :  { %470 = vmatprep.subr.bf16.mxu0 %v1619_v42  ;;  %1134 = vmatprep.subr.bf16.mxu1 %v1622_v43  ;;  %v2037_v42 = vpack.c.bf16 %v2033_v39, %v2031_v38  ;;  %v1704_v43 = vld [vmem:[#allocation8 + $0x10] ss:$24 sps:$4 sm:$0xff]  }
  0x76   :  { %471 = vmatpush1.bf16.msra.mxu0 %v1617_v44  ;;  %1135 = vmatpush1.bf16.msra.mxu1 %v1620_v45  ;;  %v1709_v44 = vld [vmem:[#allocation8 + $0x1b4] ss:$24 sps:$4 sm:$0xff]   ;;  %v1712_v45 = vld [vmem:[#allocation8 + $0x44] ss:$24 sps:$4 sm:$0xff]  }
  0x77   :  { %472 = vmatprep.subr.bf16.mxu0 %v1625_v46  ;;  %1136 = vmatprep.subr.bf16.mxu1 %v1628_v47  ;;  %v1707_v46 = vld [vmem:[#allocation8 + $0x1b0] ss:$24 sps:$4 sm:$0xff]   ;;  %v1710_v47 = vld [vmem:[#allocation8 + $0x40] ss:$24 sps:$4 sm:$0xff]  }
  0x7a   :  { %473 = vmatpush1.bf16.msra.mxu0 %v1623_v48  ;;  %1137 = vmatpush1.bf16.msra.mxu1 %v1626_v49  ;;  %v1715_v48 = vld [vmem:[#allocation8 + $0x1e4] ss:$24 sps:$4 sm:$0xff]   ;;  %v1718_v49 = vld [vmem:[#allocation8 + $0x74] ss:$24 sps:$4 sm:$0xff]  }
  0x7b   :  { %474 = vmatprep.subr.bf16.mxu0 %v1631_v50  ;;  %1138 = vmatprep.subr.bf16.mxu1 %v1634_v51  ;;  %v1713_v50 = vld [vmem:[#allocation8 + $0x1e0] ss:$24 sps:$4 sm:$0xff]   ;;  %v1716_v51 = vld [vmem:[#allocation8 + $0x70] ss:$24 sps:$4 sm:$0xff]  }
  0x7e   :  { %475 = vmatpush1.bf16.msra.mxu0 %v1629_v52  ;;  %1139 = vmatpush1.bf16.msra.mxu1 %v1632_v53  ;;  %v1721_v52 = vld [vmem:[#allocation8 + $0x214] ss:$24 sps:$4 sm:$0xff]   ;;  %v1724_v53 = vld [vmem:[#allocation8 + $0xa4] ss:$24 sps:$4 sm:$0xff]  }
  0x7f   :  { %476 = vmatprep.subr.bf16.mxu0 %v1637_v54  ;;  %1140 = vmatprep.subr.bf16.mxu1 %v1640_v55  ;;  %v1719_v54 = vld [vmem:[#allocation8 + $0x210] ss:$24 sps:$4 sm:$0xff]   ;;  %v1722_v55 = vld [vmem:[#allocation8 + $0xa0] ss:$24 sps:$4 sm:$0xff]  }
  0x82   :  { %477 = vmatpush1.bf16.msra.mxu0 %v1635_v56  ;;  %1141 = vmatpush1.bf16.msra.mxu1 %v1638_v57  ;;  %v1727_v56 = vld [vmem:[#allocation8 + $0x244] ss:$24 sps:$4 sm:$0xff]   ;;  %v1730_v57 = vld [vmem:[#allocation8 + $0xd4] ss:$24 sps:$4 sm:$0xff]  }
  0x83   :  { %478 = vmatprep.subr.bf16.mxu0 %v1643_v58  ;;  %1142 = vmatprep.subr.bf16.mxu1 %v1646_v59  ;;  %v1725_v58 = vld [vmem:[#allocation8 + $0x240] ss:$24 sps:$4 sm:$0xff]   ;;  %v1728_v59 = vld [vmem:[#allocation8 + $0xd0] ss:$24 sps:$4 sm:$0xff]  }
  0x86   :  { %479 = vmatpush1.bf16.msra.mxu0 %v1641_v60  ;;  %1143 = vmatpush1.bf16.msra.mxu1 %v1644_v61  ;;  %v1733_v60 = vld [vmem:[#allocation8 + $0x274] ss:$24 sps:$4 sm:$0xff]   ;;  %v1736_v61 = vld [vmem:[#allocation8 + $0x104] ss:$24 sps:$4 sm:$0xff]  }
  0x87   :  { %480 = vmatprep.subr.bf16.mxu0 %v1649_v62  ;;  %1144 = vmatprep.subr.bf16.mxu1 %v1652_v63  ;;  %v1731_v62 = vld [vmem:[#allocation8 + $0x270] ss:$24 sps:$4 sm:$0xff]   ;;  %v1734_v63 = vld [vmem:[#allocation8 + $0x100] ss:$24 sps:$4 sm:$0xff]  }
  0x8a   :  { %481 = vmatpush1.bf16.msra.mxu0 %v1647_v0  ;;  %1145 = vmatpush1.bf16.msra.mxu1 %v1650_v1  ;;  %v1739_v0 = vld [vmem:[#allocation8 + $0x2a4] ss:$24 sps:$4 sm:$0xff]   ;;  %v1742_v1 = vld [vmem:[#allocation8 + $0x134] ss:$24 sps:$4 sm:$0xff]  }
  0x8b   :  { %1087 = vmatprep.subr.bf16.mxu0 %v1655_v2  ;;  %1146 = vmatprep.subr.bf16.mxu1 %v1658_v3  ;;  %v1737_v2 = vld [vmem:[#allocation8 + $0x2a0] ss:$24 sps:$4 sm:$0xff]   ;;  %v1740_v3 = vld [vmem:[#allocation8 + $0x130] ss:$24 sps:$4 sm:$0xff]  }
  0x8d   :  { %499 = vmatmul.mubr.bf16.vlgmr.msra.gmra.mrb[4].mxu0 %v2015_v36  ;;  %v1698_v36 = vld [vmem:[#allocation8 + $0x2d8] ss:$24 sps:$4 sm:$0xff]  }
  0x8e   :  { %1088 = vmatpush1.bf16.msra.mxu0 %v1653_v4  ;;  %1147 = vmatpush1.bf16.msra.mxu1 %v1656_v5  ;;  %v1745_v4 = vld [vmem:[#allocation8 + $0x2d4] ss:$24 sps:$4 sm:$0xff]   ;;  %v1748_v5 = vld [vmem:[#allocation8 + $0x164] ss:$24 sps:$4 sm:$0xff]  }
  0x8f   :  { %1089 = vmatprep.subr.bf16.mxu0 %v1661_v6  ;;  %1148 = vmatprep.subr.bf16.mxu1 %v1664_v7  ;;  %v1743_v6 = vld [vmem:[#allocation8 + $0x2d0] ss:$24 sps:$4 sm:$0xff]   ;;  %v1746_v7 = vld [vmem:[#allocation8 + $0x160] ss:$24 sps:$4 sm:$0xff]  }
  0x90   :  { %1119 = vmatprep.mubr.bf16.mxu0 %v2026_v10 }
  0x92   :  { %1090 = vmatpush1.bf16.msra.mxu0 %v1659_v11  ;;  %1149 = vmatpush1.bf16.msra.mxu1 %v1662_v12  ;;  %v1749_v11 = vld [vmem:[#allocation8 + $0x190] ss:$24 sps:$4 sm:$0xff]   ;;  %v1754_v12 = vld [vmem:[#allocation8 + $0x1c4] ss:$24 sps:$4 sm:$0xff]  }
  0x93   :  { %1091 = vmatprep.subr.bf16.mxu0 %v1667_v13  ;;  %1150 = vmatprep.subr.bf16.mxu1 %v1670_v14  ;;  %v1752_v13 = vld [vmem:[#allocation8 + $0x1c0] ss:$24 sps:$4 sm:$0xff]   ;;  %v1757_v14 = vld [vmem:[#allocation8 + $0x1f4] ss:$24 sps:$4 sm:$0xff]  }
  0x96   :  { %1092 = vmatpush1.bf16.msra.mxu0 %v1665_v15  ;;  %1151 = vmatpush1.bf16.msra.mxu1 %v1668_v16  ;;  %v1755_v15 = vld [vmem:[#allocation8 + $0x1f0] ss:$24 sps:$4 sm:$0xff]   ;;  %v1760_v16 = vld [vmem:[#allocation8 + $0x224] ss:$24 sps:$4 sm:$0xff]  }
  0x97   :  { %1093 = vmatprep.subr.bf16.mxu0 %v1673_v17  ;;  %1152 = vmatprep.subr.bf16.mxu1 %v1676_v18  ;;  %v1758_v17 = vld [vmem:[#allocation8 + $0x220] ss:$24 sps:$4 sm:$0xff]   ;;  %v1763_v18 = vld [vmem:[#allocation8 + $0x254] ss:$24 sps:$4 sm:$0xff]  }
  0x9a   :  { %1094 = vmatpush1.bf16.msra.mxu0 %v1671_v19  ;;  %1153 = vmatpush1.bf16.msra.mxu1 %v1674_v20  ;;  %v1761_v19 = vld [vmem:[#allocation8 + $0x250] ss:$24 sps:$4 sm:$0xff]   ;;  %v1766_v20 = vld [vmem:[#allocation8 + $0x284] ss:$24 sps:$4 sm:$0xff]  }
  0x9b   :  { %1095 = vmatprep.subr.bf16.mxu0 %v1679_v21  ;;  %1154 = vmatprep.subr.bf16.mxu1 %v1682_v22  ;;  %v1764_v21 = vld [vmem:[#allocation8 + $0x280] ss:$24 sps:$4 sm:$0xff]   ;;  %v1769_v22 = vld [vmem:[#allocation8 + $0x2b4] ss:$24 sps:$4 sm:$0xff]  }
  0x9e   :  { %1096 = vmatpush1.bf16.msra.mxu0 %v1677_v23  ;;  %1155 = vmatpush1.bf16.msra.mxu1 %v1680_v24  ;;  %v1767_v23 = vld [vmem:[#allocation8 + $0x2b0] ss:$24 sps:$4 sm:$0xff]   ;;  %v1772_v24 = vld [vmem:[#allocation8 + $0x2e4] ss:$24 sps:$4 sm:$0xff]  }
  0x9f   :  { %1097 = vmatprep.subr.bf16.mxu0 %v1685_v25  ;;  %1156 = vmatprep.subr.bf16.mxu1 %v1688_v26  ;;  %v1770_v25 = vld [vmem:[#allocation8 + $0x2e0] ss:$24 sps:$4 sm:$0xff]  }
  0xa2   :  { %1098 = vmatpush1.bf16.msra.mxu0 %v1683_v27  ;;  %1157 = vmatpush1.bf16.msra.mxu1 %v1686_v28 }
  0xa3   :  { %1099 = vmatprep.subr.bf16.mxu0 %v1691_v29  ;;  %1158 = vmatprep.subr.bf16.mxu1 %v1694_v30 }
  0xa6   :  { %1100 = vmatpush1.bf16.msra.mxu0 %v1689_v31  ;;  %1159 = vmatpush1.bf16.msra.mxu1 %v1692_v32 }
  0xa7   :  { %1101 = vmatprep.subr.bf16.mxu0 %v1697_v33  ;;  %1160 = vmatprep.subr.bf16.mxu1 %v1700_v34  ;;  %v1226_v34 = vlaneseq }
  0xaa   :  { %1102 = vmatpush1.bf16.msra.mxu0 %v1695_v35  ;;  %1161 = vmatpush1.bf16.msra.mxu1 %v1698_v36  ;;  %v1227_v35 = vshrl.u32 %v1226_v34, 7 }
  0xab   :  { %1103 = vmatprep.subr.bf16.mxu0 %v1703_v37  ;;  %1173 = vmatprep.subr.bf16.mxu1 %v1706_v40 }
  0xac   :  { %v1228_v37 = vsub.s32 0, %v1227_v35 }
  0xad   :  { %1163 = vmatmul.mubr.bf16.vlgmr.msra.gmra.mrb[0].mxu1 %v2037_v42 }
  0xae   :  { %1104 = vmatpush1.bf16.msra.mxu0 %v1701_v41  ;;  %1174 = vmatpush1.bf16.msra.mxu1 %v1704_v43  ;;  %v1232_v41 = vsub.s32 1, %v1227_v35 }
  0xaf   :  { %1105 = vmatprep.subr.bf16.mxu0 %v1709_v44  ;;  %1175 = vmatprep.subr.bf16.mxu1 %v1712_v45 }
  0xb0   :  { %1205 = vmatprep.mubr.bf16.mxu1 %v2026_v10  ;;  %v1751_v10 = vld [vmem:[#allocation8 + $0x194] ss:$24 sps:$4 sm:$0xff]  }
  0xb2   :  { %1106 = vmatpush1.bf16.msra.mxu0 %v1707_v46  ;;  %1176 = vmatpush1.bf16.msra.mxu1 %v1710_v47 }
  0xb3   :  { %1107 = vmatprep.subr.bf16.mxu0 %v1715_v48  ;;  %1177 = vmatprep.subr.bf16.mxu1 %v1718_v49 }
  0xb6   :  { %1108 = vmatpush1.bf16.msra.mxu0 %v1713_v50  ;;  %1178 = vmatpush1.bf16.msra.mxu1 %v1716_v51 }
  0xb7   :  { %1109 = vmatprep.subr.bf16.mxu0 %v1721_v52  ;;  %1179 = vmatprep.subr.bf16.mxu1 %v1724_v53  ;;  %v1236_v53 = vsub.s32 2, %v1227_v35 }
  0xba   :  { %1110 = vmatpush1.bf16.msra.mxu0 %v1719_v54  ;;  %1180 = vmatpush1.bf16.msra.mxu1 %v1722_v55 }
  0xbb   :  { %1111 = vmatprep.subr.bf16.mxu0 %v1727_v56  ;;  %1181 = vmatprep.subr.bf16.mxu1 %v1730_v57  ;;  %v1240_v57 = vsub.s32 3, %v1227_v35 }
  0xbe   :  { %1112 = vmatpush1.bf16.msra.mxu0 %v1725_v58  ;;  %1182 = vmatpush1.bf16.msra.mxu1 %v1728_v59 }
  0xbf   :  { %1113 = vmatprep.subr.bf16.mxu0 %v1733_v60  ;;  %1183 = vmatprep.subr.bf16.mxu1 %v1736_v61 }
  0xc2   :  { %1114 = vmatpush1.bf16.msra.mxu0 %v1731_v62  ;;  %1184 = vmatpush1.bf16.msra.mxu1 %v1734_v63 }
  0xc3   :  { %1115 = vmatprep.subr.bf16.mxu0 %v1739_v0  ;;  %1185 = vmatprep.subr.bf16.mxu1 %v1742_v1  ;;  %v1302_v0 = vld [vmem:[%s2092_s5] sm:$0x3] }
  0xc6   :  { %1116 = vmatpush1.bf16.msra.mxu0 %v1737_v2  ;;  %1186 = vmatpush1.bf16.msra.mxu1 %v1740_v3 }
  0xc7   :  { %1117 = vmatprep.subr.bf16.mxu0 %v1745_v4  ;;  %1187 = vmatprep.subr.bf16.mxu1 %v1748_v5  ;;  %v1286_v4 = vld [vmem:[%s2091_s4 + $0x4] sm:$0x3] }
  0xca   :  { %1118 = vmatpush1.bf16.msra.mxu0 %v1743_v6  ;;  %1188 = vmatpush1.bf16.msra.mxu1 %v1746_v7  ;;  %v1307_v7 = vrot.slane %v1302_v0, %v1228_v37 }
  0xcb   :  { %1189 = vmatprep.subr.bf16.mxu1 %v1751_v10 }
  0xcd   :  { %1120 = vmatmul.mubr.bf16.vlgmr.msra.gmra.mrb[0].mxu0 %v2037_v42 }
  0xce   :  { %1190 = vmatpush1.bf16.msra.mxu1 %v1749_v11 }
  0xcf   :  { %1191 = vmatprep.subr.bf16.mxu1 %v1754_v12 }
  0xd2   :  { %1192 = vmatpush1.bf16.msra.mxu1 %v1752_v13  ;;  %v1291_v13 = vrot.slane %v1286_v4, %v1228_v37 }
  0xd3   :  { %1193 = vmatprep.subr.bf16.mxu1 %v1757_v14 }
  0xd6   :  { %1194 = vmatpush1.bf16.msra.mxu1 %v1755_v15 }
  0xd7   :  { %1195 = vmatprep.subr.bf16.mxu1 %v1760_v16  ;;  %v1311_v16 = vrot.slane %v1302_v0, %v1232_v41 }
  0xda   :  { %1196 = vmatpush1.bf16.msra.mxu1 %v1758_v17 }
  0xdb   :  { %1197 = vmatprep.subr.bf16.mxu1 %v1763_v18  ;;  %v1295_v18 = vrot.slane %v1286_v4, %v1232_v41 }
  0xde   :  { %1198 = vmatpush1.bf16.msra.mxu1 %v1761_v19 }
  0xdf   :  { %1199 = vmatprep.subr.bf16.mxu1 %v1766_v20 }
  0xe2   :  { %1200 = vmatpush1.bf16.msra.mxu1 %v1764_v21 }
  0xe3   :  { %1201 = vmatprep.subr.bf16.mxu1 %v1769_v22 }
  0xe6   :  { %1202 = vmatpush1.bf16.msra.mxu1 %v1767_v23 }
  0xe7   :  { %1203 = vmatprep.subr.bf16.mxu1 %v1772_v24 }
  0xea   :  { %1204 = vmatpush1.bf16.msra.mxu1 %v1770_v25 }
  0xed   :  { %1206 = vmatmul.mubr.bf16.vlgmr.msra.gmra.mrb[4].mxu1 %v2037_v42  ;;  %v1224_v42 = vld [vmem:[%s2091_s4] sm:$0xf]  ;;  %s1926_s4 = smov [#allocation10]  }
  0xee   :  { %v1229_v44 = vrot.slane %v1224_v42, %v1228_v37  ;;  %v1233_v46 = vrot.slane %v1224_v42, %v1232_v41  ;;  %v1237_v56 = vrot.slane %v1224_v42, %v1236_v53  ;;  %v1241_v59 = vrot.slane %v1224_v42, %v1240_v57  ;;  %s1377_s5 = sshll.u32 %s1926_s4, 4  ;;  %s1378_s5 = int_to_ptr.vmem [resolvable:$true] %s1377_s5 }
  0xef   :  { %s1885_s30 = scalar_lea.vmem %s1378_s5, 512  ;;  %p1890_p5 = scmp.lt.s32.totalorder %s1378_s5, %s1378_s5 }
  0xf0   :  { %p1886_p4 = scmp.ne.s32.totalorder %s1378_s5, %s1885_s30  ;;  %p1891_p6 = scmp.lt.s32.totalorder %s1885_s30, %s1885_s30 }
  0xf2   :  { %p1892_p7 = por %p1891_p6, %p1890_p5 }
  0xf4   :  { %p1893_p8 = pnand %p1892_p7, %p1886_p4 }
 0x160   :  { %v2043_v26 = vpop.f32.mrb[4].mxu0 }
 0x161   :  { %v2045_v27 = vpop.f32.mrb[5].mxu0  ;;  %v1298_v24 = vadd.f32 %v1291_v13, %v2043_v26 }
 0x162   :  { %v2047_v28 = vpop.f32.mrb[6].mxu0  ;;  %v1299_v37 = vadd.f32 %v1295_v18, %v2045_v27 }
 0x163   :  { %v2049_v29 = vpop.f32.mrb[7].mxu0 }
 0x164   :  { %v1301_v26 = vadd.f32 %v1295_v18, %v2049_v29 }
 0x180   :  { %v1164_v30 = vpop.f32.mrb[0].mxu1 }
 0x181   :  { %v1166_v31 = vpop.f32.mrb[1].mxu1  ;;  %v1248_v58 = vadd.f32 %v1237_v56, %v1164_v30 }
 0x182   :  { %v1168_v32 = vpop.f32.mrb[2].mxu1  ;;  %v1249_v63 = vadd.f32 %v1241_v59, %v1166_v31 }
 0x183   :  { %v1170_v33 = vpop.f32.mrb[3].mxu1  ;;  %v1252_v60 = vadd.f32 %v1237_v56, %v1168_v32  ;;  %v1256_v62 = vmul.f32 0.5, %v1248_v58 }
 0x184   :  { %v1253_v2 = vadd.f32 %v1241_v59, %v1170_v33  ;;  %v1257_v10 = vmul.f32 0.5, %v1249_v63 }
 0x185   :  { %v1260_v5 = vmul.f32 0.5, %v1252_v60 }
 0x186   :  { %v1261_v14 = vmul.f32 0.5, %v1253_v2 }
 0x1a0   :  { %v1121_v36 = vpop.f32.mrb[0].mxu0 }
 0x1a1   :  { %v1123_v40 = vpop.f32.mrb[1].mxu0  ;;  %v1246_v47 = vadd.f32 %v1229_v44, %v1121_v36 }
 0x1a2   :  { %v1125_v43 = vpop.f32.mrb[2].mxu0  ;;  %v1247_v48 = vadd.f32 %v1233_v46, %v1123_v40 }
 0x1a3   :  { %v1127_v45 = vpop.f32.mrb[3].mxu0  ;;  %v1250_v49 = vadd.f32 %v1229_v44, %v1125_v43  ;;  %v1254_v51 = vmul.f32 0.5, %v1246_v47  ;;  %v1300_v43 = vadd.f32 %v1291_v13, %v2047_v28 }
 0x1a4   :  { %v1251_v50 = vadd.f32 %v1233_v46, %v1127_v45  ;;  %v1255_v52 = vmul.f32 0.5, %v1247_v48 }
 0x1a5   :  { %v1258_v54 = vmul.f32 0.5, %v1250_v49  ;;  %1773 = vtanh.f32 %v1254_v51 }
 0x1a6   :  { %v1259_v55 = vmul.f32 0.5, %v1251_v50  ;;  %1775 = vtanh.f32 %v1255_v52 }
 0x1a7   :  { %1777 = vtanh.f32 %v1258_v54 }
 0x1a8   :  { %1779 = vtanh.f32 %v1259_v55 }
 0x1a9   :  { %1781 = vtanh.f32 %v1256_v62 }
 0x1aa   :  { %1783 = vtanh.f32 %v1260_v5 }
 0x1ab   :  { %1785 = vtanh.f32 %v1257_v10 }
 0x1ac   :  { %1787 = vtanh.f32 %v1261_v14 }
 0x1af   :  { %v1774_v61 = vpop.eup %1773 }
 0x1b0   :  { %v1776_v1 = vpop.eup %1775  ;;  %v1270_v11 = vmul.f32 0.5, %v1774_v61 }
 0x1b1   :  { %v1778_v3 = vpop.eup %1777  ;;  %v1271_v12 = vmul.f32 0.5, %v1776_v1 }
 0x1b2   :  { %v1780_v6 = vpop.eup %1779  ;;  %v1274_v15 = vmul.f32 0.5, %v1778_v3  ;;  %v1278_v20 = vadd.f32 0.5, %v1270_v11 }
 0x1b3   :  { %v1275_v17 = vmul.f32 0.5, %v1780_v6  ;;  %v1279_v21 = vadd.f32 0.5, %v1271_v12  ;;  %v1782_v50 = vpop.eup %1781 }
 0x1b4   :  { %v1282_v31 = vadd.f32 0.5, %v1274_v15  ;;  %v1784_v55 = vpop.eup %1783  ;;  %v1272_v56 = vmul.f32 0.5, %v1782_v50 }
 0x1b5   :  { %v1283_v34 = vadd.f32 0.5, %v1275_v17  ;;  %v1786_v28 = vpop.eup %1785  ;;  %v1276_v59 = vmul.f32 0.5, %v1784_v55 }
 0x1b6   :  { %v1788_v58 = vpop.eup %1787  ;;  %v1280_v29 = vadd.f32 0.5, %v1272_v56  ;;  %v1273_v60 = vmul.f32 0.5, %v1786_v28 }
 0x1b7   :  { %v1284_v61 = vadd.f32 0.5, %v1276_v59  ;;  %v1277_v62 = vmul.f32 0.5, %v1788_v58 }
 0x1b8   :  { %v1338_v63 = vsub.f32 1.0, %v1280_v29  ;;  %v1281_v0 = vadd.f32 0.5, %v1273_v60  ;;  %v1346_v13 = vmul.f32 %v1280_v29, %v2031_v38  ;;  %v1362_v14 = vmul.f32 %v1280_v29, %v2020_v8 }
 0x1b9   :  { %v1339_v3 = vsub.f32 1.0, %v1284_v61  ;;  %v1285_v4 = vadd.f32 0.5, %v1277_v62 }
 0x1c0   :  { %v1207_v19 = vpop.f32.mrb[4].mxu1 }
 0x1c1   :  { %v1314_v22 = vadd.f32 %v1307_v7, %v1207_v19  ;;  %v1209_v23 = vpop.f32.mrb[5].mxu1 }
 0x1c2   :  { %v1315_v25 = vadd.f32 %v1311_v16, %v1209_v23  ;;  %v1211_v30 = vpop.f32.mrb[6].mxu1  ;;  %v1350_v23 = vmul.f32 %v1281_v0, %v2020_v8 }
 0x1c3   :  { %v1318_v32 = vmul.f32 %v1314_v22, %v1278_v20  ;;  %v1332_v33 = vmul.f32 %v1314_v22, %v1279_v21  ;;  %v1316_v35 = vadd.f32 %v1307_v7, %v1211_v30  ;;  %v1213_v36 = vpop.f32.mrb[7].mxu1  ;;  %v1363_v22 = vmul.f32 %v1284_v61, %v2022_v9 }
 0x1c4   :  { %v1322_v40 = vmul.f32 %v1315_v25, %v1279_v21  ;;  %v1328_v41 = vmul.f32 %v1315_v25, %v1278_v20  ;;  %v1317_v42 = vadd.f32 %v1311_v16, %v1213_v36  ;;  %v1347_v21 = vmul.f32 %v1284_v61, %v2033_v39 }
 0x1c5   :  { %v1320_v44 = vadd.f32 %v1318_v32, %v1298_v24  ;;  %v1319_v45 = vmul.f32 %v1316_v35, %v1282_v31  ;;  %v1333_v46 = vmul.f32 %v1316_v35, %v1283_v34  ;;  %v1366_v24 = vmul.f32 %v1281_v0, %v2031_v38 }
 0x1c6   :  { %v1330_v47 = vadd.f32 %v1328_v41, %v1299_v37  ;;  %v1323_v48 = vmul.f32 %v1317_v42, %v1283_v34  ;;  %v1329_v49 = vmul.f32 %v1317_v42, %v1282_v31  ;;  %v1367_v34 = vmul.f32 %v1285_v4, %v2033_v39 }
 0x1c7   :  { %v1324_v51 = vsub.f32 %v1320_v44, %v1322_v40  ;;  %v1321_v52 = vadd.f32 %v1319_v45, %v1300_v43 }
 0x1c8   :  { %v1334_v53 = vadd.f32 %v1332_v33, %v1330_v47  ;;  %v1331_v54 = vadd.f32 %v1329_v49, %v1301_v26  ;;  %v1351_v33 = vmul.f32 %v1285_v4, %v2022_v9 }
 0x1c9   :  { %1789 = vtanh.f32 %v1324_v51  ;;  %v1325_v27 = vsub.f32 %v1321_v52, %v1323_v48 }
 0x1ca   :  { %1791 = vtanh.f32 %v1334_v53  ;;  %v1335_v57 = vadd.f32 %v1333_v46, %v1331_v54 }
 0x1cb   :  { %1793 = vtanh.f32 %v1325_v27 }
 0x1cc   :  { %1795 = vtanh.f32 %v1335_v57 }
 0x1d3   :  { %v1790_v1 = vpop.eup %1789 }
 0x1d4   :  { %v1792_v2 = vpop.eup %1791  ;;  %v1340_v5 = vmul.f32 %v1790_v1, %v1338_v63  ;;  %v1358_v6 = vmul.f32 %v1790_v1, %v1281_v0 }
 0x1d5   :  { %v1794_v7 = vpop.eup %1793  ;;  %v1342_v10 = vmul.f32 %v1792_v2, %v1281_v0  ;;  %v1356_v11 = vmul.f32 %v1792_v2, %v1338_v63 }
 0x1d6   :  { %v1796_v12 = vpop.eup %1795  ;;  %v1341_v15 = vmul.f32 %v1794_v7, %v1339_v3  ;;  %v1359_v16 = vmul.f32 %v1794_v7, %v1285_v4 }
 0x1d7   :  { %v1343_v17 = vmul.f32 %v1796_v12, %v1285_v4  ;;  %v1344_v18 = vadd.f32 %v1342_v10, %v1340_v5  ;;  %v1357_v19 = vmul.f32 %v1796_v12, %v1339_v3  ;;  %v1360_v20 = vsub.f32 %v1356_v11, %v1358_v6 }
 0x1d9   :  { %v1345_v25 = vadd.f32 %v1343_v17, %v1341_v15  ;;  %v1348_v30 = vadd.f32 %v1346_v13, %v1344_v18  ;;  %v1361_v31 = vsub.f32 %v1357_v19, %v1359_v16  ;;  %v1364_v32 = vadd.f32 %v1362_v14, %v1360_v20 }
 0x1db   :  { %v1349_v35 = vadd.f32 %v1347_v21, %v1345_v25  ;;  %v1352_v36 = vsub.f32 %v1348_v30, %v1350_v23  ;;  %v1365_v37 = vadd.f32 %v1363_v22, %v1361_v31  ;;  %v1368_v40 = vadd.f32 %v1366_v24, %v1364_v32 }
 0x1dd   :  { %v1353_v41 = vsub.f32 %v1349_v35, %v1351_v33  ;;  %1354 = vst [vmem:[#allocation10] sm:$0xff] %v1352_v36  ;;  %v1369_v42 = vadd.f32 %v1367_v34, %v1365_v37  ;;  %1370 = vst [vmem:[#allocation10 + $0x8] sm:$0xff] %v1368_v40 }
 0x1df   :  { %1355 = vst [vmem:[#allocation10 + $0x10] sm:$0xff] %v1353_v41  ;;  %1371 = vst [vmem:[#allocation10 + $0x18] sm:$0xff] %v1369_v42 }
 0x1e0   :  { %1896 = shalt.err (!%p1893_p8)
}
 0x1e1   :  { %s1897_s11 = scalar_lea.hbm %s2093_s6, 512 }
 0x1e2   :  { %p1898_p9 = scmp.ne.s32.totalorder %s2093_s6, %s1897_s11  ;;  %p1901_p10 = scmp.lt.u32.totalorder %s1897_s11, %s2093_s6 }
 0x1e4   :  { %p1903_p11 = pnand %p1901_p10, %p1898_p9 }
 0x1e6   :  { %1906 = shalt.err (!%p1903_p11)
}
 0x1e7   :  { %1383 = dma.vmem_to_hbm [thread:$0]  %s1378_s5, 512, %s2093_s6, [#allocation4], %s1916_s7, %s1916_s7, %s1917_s8  }
 0x1e8   :  { %1913 = dma.done.wait [#allocation4], 512  }
 0x1e9   :  { %1914 = vsyncadd [#allocation4], 4294966784 }
 0x1ea   :  { %1387 = vsyncpa [#allocation3], 1 }
 0x1eb   :  { %1388 = vsyncpa [#allocation6], 1 }
 0x1ec   :  { %1389 = vsyncpa [#allocation9], 1 }
 0x1ed   :  { %1390 = vsyncpa [#allocation4], 1 }

</bundles_post_ra>
